<compile_context>
chip_gen: v6e
topology: v6e:2x2x1
jax: 0.10.0
libtpu: 0.0.40
codegen_flags: <defaults>
</compile_context>

<pallas_src>
import functools

import jax
import jax.numpy as jnp
from jax import lax
from jax.experimental import pallas as pl
from jax.experimental.pallas import tpu as pltpu


# First layer is done as VPU rank-1 updates (no MXU) when N_Input <= this.
_RANK1_MAX_NIN = 4


def _fcn_kernel(x_ref, w_in_ref, b_in_ref, wh_ref, bh_ref, w_out_ref, b_out_ref,
                o_ref, *, n_in, n_hidden_layers, use_bf16_matmul):
    """Feature-major MLP: activations live as (features, batch_tile)."""

    def mm(w, h):
        # MXU matmul with f32 accumulation.  Optional bf16 operands restore
        # native MXU rate (f32xf32 lowers to multi-pass emulation).
        if use_bf16_matmul:
            w = w.astype(jnp.bfloat16)
            h = h.astype(jnp.bfloat16)
        return jnp.dot(w, h, preferred_element_type=jnp.float32)

    # ---- First layer: h = tanh(W_in @ x + b_in) ------------------------------
    if n_in <= _RANK1_MAX_NIN:
        # K is tiny (1-4): a matmul would pay a full MXU push/pop for a handful
        # of products.  Rank-1 VPU updates instead (exact f32, frees the MXU).
        acc = w_in_ref[:, 0:1] * x_ref[0:1, :]            # (H,1)*(1,Bt)->(H,Bt)
        for k in range(1, n_in):
            acc = acc + w_in_ref[:, k:k + 1] * x_ref[k:k + 1, :]
        h = jnp.tanh(acc + b_in_ref[...])
    else:
        h = jnp.tanh(mm(w_in_ref[...], x_ref[...]) + b_in_ref[...])

    # ---- Hidden layers: h = tanh(Wh[l] @ h + bh[l]) ---------------------------
    def layer(l, h):
        return jnp.tanh(mm(wh_ref[l], h) + bh_ref[l])

    if n_hidden_layers <= 4:
        # Tiny nets (demo has 2 hidden layers): static unroll is neutral.
        for l in range(n_hidden_layers):
            h = layer(l, h)
    else:
        # Deeper PINNs: visible loop bounds live ranges / instruction stream.
        h = lax.fori_loop(0, n_hidden_layers, layer, h, unroll=True)

    # ---- Output layer: y = W_out @ h + b_out ----------------------------------
    y = mm(w_out_ref[...], h) + b_out_ref[...]
    o_ref[...] = y.astype(o_ref.dtype)                    # lane-dense store


def _round_up(n, m):
    return ((n + m - 1) // m) * m


def _tensorcores_per_device():
    """Heuristic: chips with 2 TensorCores per device (v4/v5p megacore, v7x)."""
    try:
        kind = jax.devices()[0].device_kind.lower()
    except Exception:
        return 1
    for tag in ("v4", "v5p", "v7"):
        if tag in kind:
            return 2
    return 1


def _select_batch_tile(B, n_hidden, requested):
    """Generation-aware batch tile (multiple of 128 on the lane axis)."""
    # Keep the live (H, bt) f32 activation within ~half the 256 KiB vreg file
    # (H*bt*4 <= 128 KiB) so the layer loop does not spill every iteration.
    vreg_cap = max(128, ((128 * 1024) // max(4 * n_hidden, 1)) // 128 * 128)
    hard_cap = 1024
    b128 = _round_up(B, 128)

    if requested is not None:
        bt = max(128, (requested // 128) * 128)
    elif _tensorcores_per_device() >= 2:
        # Multi-TC chip: make sure the "parallel" grid axis has >= 2 steps so
        # both TensorCores get work (otherwise one core idles).
        bt = max(128, ((_round_up(B, 256) // 2) // 128) * 128)
    else:
        # Single TC (v5e/v6e): biggest tile == fewest ~0.35 us grid steps.
        bt = b128

    bt = min(bt, vreg_cap, hard_cap, b128)
    return max(bt, 128)


def fcn_forward(x, params, *, batch_tile=None, use_bf16_matmul=False):
    """Forward pass of FCN. x: (B, N_Input). Returns (B, N_Output)."""
    w_in, b_in, wh, bh, w_out, b_out = params
    B, n_in = x.shape
    n_hidden = w_in.shape[0]
    n_out = w_out.shape[0]
    n_hidden_layers = wh.shape[0]
    assert n_hidden_layers >= 1, "expected N_Layers >= 2 (at least one hidden block)"

    bt = _select_batch_tile(B, n_hidden, batch_tile)
    B_pad = _round_up(B, bt)

    # Feature-major: zero-pad the batch, transpose once -> (n_in, B_pad).
    if B_pad != B:
        x = jnp.pad(x, ((0, B_pad - B), (0, 0)))
    xT = x.T

    grid = (B_pad // bt,)
    kernel = functools.partial(_fcn_kernel, n_in=n_in,
                               n_hidden_layers=n_hidden_layers,
                               use_bf16_matmul=use_bf16_matmul)

    itemsize = jnp.dtype(x.dtype).itemsize
    param_bytes = sum(int(p.size) * jnp.dtype(p.dtype).itemsize
                      for p in (w_in, b_in, wh, bh, w_out, b_out))
    io_bytes = 2 * (n_in + n_out) * bt * itemsize          # double-buffered x/out tiles
    act_bytes = 4 * n_hidden * bt * 4                      # activation headroom

    # Parameter index maps are constant: once their double-buffered footprint
    # is non-trivial, single-buffer them so deep/wide configs never blow
    # v7x's 64 MiB VMEM (the demo-sized net takes the default path).
    if 2 * param_bytes > (16 << 20):
        param_kw = dict(pipeline_mode=pl.Buffered(1))
        resident_param_bytes = param_bytes
    else:
        param_kw = {}
        resident_param_bytes = 2 * param_bytes

    needed = resident_param_bytes + io_bytes + act_bytes
    vmem_limit = int(min(96 << 20, max(32 << 20, 2 * needed + (4 << 20))))

    flops = 2 * B_pad * n_hidden * (n_in + n_hidden_layers * n_hidden + n_out)
    transcendentals = B_pad * n_hidden * (n_hidden_layers + 1)
    bytes_accessed = param_bytes + B_pad * (n_in + n_out) * itemsize

    outT = pl.pallas_call(
        kernel,
        out_shape=jax.ShapeDtypeStruct((n_out, B_pad), x.dtype),
        grid_spec=pltpu.PrefetchScalarGridSpec(
            num_scalar_prefetch=0,
            grid=grid,
            in_specs=[
                # x^T: tiled over the batch (lane) axis.
                pl.BlockSpec((n_in, bt), lambda i: (0, i)),
                # Parameters: full arrays, same block every grid step.
                pl.BlockSpec((n_hidden, n_in), lambda i: (0, 0), **param_kw),
                pl.BlockSpec((n_hidden, 1), lambda i: (0, 0), **param_kw),
                pl.BlockSpec((n_hidden_layers, n_hidden, n_hidden),
                             lambda i: (0, 0, 0), **param_kw),
                pl.BlockSpec((n_hidden_layers, n_hidden, 1),
                             lambda i: (0, 0, 0), **param_kw),
                pl.BlockSpec((n_out, n_hidden), lambda i: (0, 0), **param_kw),
                pl.BlockSpec((n_out, 1), lambda i: (0, 0), **param_kw),
            ],
            out_specs=pl.BlockSpec((n_out, bt), lambda i: (0, i)),
        ),
        compiler_params=pltpu.CompilerParams(
            dimension_semantics=("parallel",),
            vmem_limit_bytes=vmem_limit),
        cost_estimate=pl.CostEstimate(
            flops=int(flops),
            transcendentals=int(transcendentals),
            bytes_accessed=int(bytes_accessed)),
    )(xT, w_in, b_in, wh, bh, w_out, b_out)

    # Slice padding off first, then transpose only the real data.
    return outT[:, :B].T


def init_fcn_params(key, n_input, n_output, n_hidden, n_layers,
                    dtype=jnp.float32):
    """Deterministic synthetic parameters, PyTorch-native (out, in) weights.

    Biases are stored as (features, 1) so they broadcast over the lane (batch)
    axis inside the kernel with no reshape.
    """
    n_hidden_layers = n_layers - 1
    keys = jax.random.split(key, 6)
    w_in = jax.random.normal(keys[0], (n_hidden, n_input), dtype) * 0.5
    b_in = jax.random.normal(keys[1], (n_hidden, 1), dtype) * 0.1
    wh = jax.random.normal(keys[2], (n_hidden_layers, n_hidden, n_hidden),
                           dtype) * (1.0 / jnp.sqrt(n_hidden))
    bh = jax.random.normal(keys[3], (n_hidden_layers, n_hidden, 1), dtype) * 0.1
    w_out = jax.random.normal(keys[4], (n_output, n_hidden), dtype) * (
        1.0 / jnp.sqrt(n_hidden))
    b_out = jax.random.normal(keys[5], (n_output, 1), dtype) * 0.1
    return (w_in, b_in, wh, bh, w_out, b_out)


def fcn_forward_ref(x, params):
    """Plain-JAX reference (PyTorch Linear semantics: y = x @ W.T + b).

    Mirrors the kernel's exact-f32 rank-1 first layer for tiny N_Input (same
    math as x @ W.T, just computed elementwise) so the comparison is not
    polluted by the default TPU matmul precision on a K=1 contraction.
    """
    w_in, b_in, wh, bh, w_out, b_out = params
    n_in = x.shape[1]
    if n_in <= _RANK1_MAX_NIN:
        pre = jnp.sum(x[:, None, :] * w_in[None, :, :], axis=-1)
    else:
        pre = x @ w_in.T
    h = jnp.tanh(pre + b_in[:, 0])
    for l in range(wh.shape[0]):
        h = jnp.tanh(h @ wh[l].T + bh[l, :, 0])
    return h @ w_out.T + b_out[:, 0]


if __name__ == "__main__":
    # Small PINN-like configuration: scalar input (time t) -> scalar output.
    N_INPUT, N_OUTPUT, N_HIDDEN, N_LAYERS = 1, 1, 32, 3
    BATCH = 200   # deliberately NOT a multiple of the tile -> exercises padding

    key = jax.random.PRNGKey(0)
    k_x, k_p = jax.random.split(key)
    x = jax.random.uniform(k_x, (BATCH, N_INPUT), jnp.float32)
    params = init_fcn_params(k_p, N_INPUT, N_OUTPUT, N_HIDDEN, N_LAYERS)
    ref = fcn_forward_ref(x, params)

    # 1) Auto (generation-aware) tile selection.
    out = fcn_forward(x, params)
    out = jax.block_until_ready(out)
    assert out.shape == (BATCH, N_OUTPUT)
    err = float(jnp.max(jnp.abs(out - ref)))
    assert err < 1e-4, f"mismatch vs reference (auto tile): max abs err {err}"

    # 2) Explicit small tile -> padded batch 256, 2-step grid (multi-core path).
    out2 = fcn_forward(x, params, batch_tile=128)
    out2 = jax.block_until_ready(out2)
    err2 = float(jnp.max(jnp.abs(out2 - ref)))
    assert err2 < 1e-4, f"mismatch vs reference (bt=128): max abs err {err2}"

    print("KERNEL_OK")
</pallas_src>

<mosaic_0001>
module attributes {stable_mosaic.version = 11 : i64} {
  func.func @_fcn_kernel(%arg0: i32, %arg1: memref<1x256xf32, #tpu.memory_space<vmem>>, %arg2: memref<32x1xf32, #tpu.memory_space<vmem>>, %arg3: memref<32x1xf32, #tpu.memory_space<vmem>>, %arg4: memref<2x32x32xf32, #tpu.memory_space<vmem>>, %arg5: memref<2x32x1xf32, #tpu.memory_space<vmem>>, %arg6: memref<1x32xf32, #tpu.memory_space<vmem>>, %arg7: memref<1x1xf32, #tpu.memory_space<vmem>>, %arg8: memref<1x256xf32, #tpu.memory_space<vmem>>) attributes {dimension_semantics = [#tpu.dimension_semantics<parallel>], iteration_bounds = array<i64: 1>, scalar_prefetch = 0 : i64, scratch_operands = 0 : i64, tpu.core_type = #tpu.core_type<tc>, window_params = [{transform_indices = @transform_0, window_bounds = array<i64: 1, 256>}, {pipeline_mode = #tpu.pipeline_mode<synchronous>, transform_indices = @transform_1, window_bounds = array<i64: 32, 1>}, {pipeline_mode = #tpu.pipeline_mode<synchronous>, transform_indices = @transform_2, window_bounds = array<i64: 32, 1>}, {pipeline_mode = #tpu.pipeline_mode<synchronous>, transform_indices = @transform_3, window_bounds = array<i64: 2, 32, 32>}, {pipeline_mode = #tpu.pipeline_mode<synchronous>, transform_indices = @transform_4, window_bounds = array<i64: 2, 32, 1>}, {pipeline_mode = #tpu.pipeline_mode<synchronous>, transform_indices = @transform_5, window_bounds = array<i64: 1, 32>}, {pipeline_mode = #tpu.pipeline_mode<synchronous>, transform_indices = @transform_6, window_bounds = array<i64: 1, 1>}, {transform_indices = @transform_7, window_bounds = array<i64: 1, 256>}]} {
    %c0 = arith.constant 0 : index
    %c0_0 = arith.constant 0 : index
    %0 = vector.load %arg2[%c0, %c0_0] : memref<32x1xf32, #tpu.memory_space<vmem>>, vector<32x1xf32>
    %c0_1 = arith.constant 0 : index
    %c0_2 = arith.constant 0 : index
    %1 = vector.load %arg1[%c0_1, %c0_2] : memref<1x256xf32, #tpu.memory_space<vmem>>, vector<1x256xf32>
    %2 = vector.broadcast %0 : vector<32x1xf32> to vector<32x256xf32>
    %3 = vector.broadcast %1 : vector<1x256xf32> to vector<32x256xf32>
    %4 = arith.mulf %2, %3 : vector<32x256xf32>
    %c0_3 = arith.constant 0 : index
    %c0_4 = arith.constant 0 : index
    %5 = vector.load %arg3[%c0_3, %c0_4] : memref<32x1xf32, #tpu.memory_space<vmem>>, vector<32x1xf32>
    %6 = vector.broadcast %5 : vector<32x1xf32> to vector<32x256xf32>
    %7 = arith.addf %4, %6 : vector<32x256xf32>
    %8 = math.tanh %7 : vector<32x256xf32>
    %c0_5 = arith.constant 0 : index
    %c0_6 = arith.constant 0 : index
    %c0_7 = arith.constant 0 : index
    %9 = vector.load %arg4[%c0_5, %c0_6, %c0_7] : memref<2x32x32xf32, #tpu.memory_space<vmem>>, vector<1x32x32xf32>
    %10 = vector.shape_cast %9 : vector<1x32x32xf32> to vector<32x32xf32>
    %cst = arith.constant dense<0.000000e+00> : vector<32x256xf32>
    %11 = tpu.matmul %10, %8, %cst {dimension_numbers = #tpu.dot_dimension_numbers<[1], [0], [0], [1], [0, 0, 1, 1], [], []>} : vector<32x32xf32>, vector<32x256xf32>, vector<32x256xf32> -> vector<32x256xf32>
    %c0_8 = arith.constant 0 : index
    %c0_9 = arith.constant 0 : index
    %c0_10 = arith.constant 0 : index
    %12 = vector.load %arg5[%c0_8, %c0_9, %c0_10] : memref<2x32x1xf32, #tpu.memory_space<vmem>>, vector<1x32x1xf32>
    %13 = vector.shape_cast %12 : vector<1x32x1xf32> to vector<32x1xf32>
    %14 = vector.broadcast %13 : vector<32x1xf32> to vector<32x256xf32>
    %15 = arith.addf %11, %14 : vector<32x256xf32>
    %16 = math.tanh %15 : vector<32x256xf32>
    %c1 = arith.constant 1 : index
    %c0_11 = arith.constant 0 : index
    %c0_12 = arith.constant 0 : index
    %17 = vector.load %arg4[%c1, %c0_11, %c0_12] : memref<2x32x32xf32, #tpu.memory_space<vmem>>, vector<1x32x32xf32>
    %18 = vector.shape_cast %17 : vector<1x32x32xf32> to vector<32x32xf32>
    %cst_13 = arith.constant dense<0.000000e+00> : vector<32x256xf32>
    %19 = tpu.matmul %18, %16, %cst_13 {dimension_numbers = #tpu.dot_dimension_numbers<[1], [0], [0], [1], [0, 0, 1, 1], [], []>} : vector<32x32xf32>, vector<32x256xf32>, vector<32x256xf32> -> vector<32x256xf32>
    %c1_14 = arith.constant 1 : index
    %c0_15 = arith.constant 0 : index
    %c0_16 = arith.constant 0 : index
    %20 = vector.load %arg5[%c1_14, %c0_15, %c0_16] : memref<2x32x1xf32, #tpu.memory_space<vmem>>, vector<1x32x1xf32>
    %21 = vector.shape_cast %20 : vector<1x32x1xf32> to vector<32x1xf32>
    %22 = vector.broadcast %21 : vector<32x1xf32> to vector<32x256xf32>
    %23 = arith.addf %19, %22 : vector<32x256xf32>
    %24 = math.tanh %23 : vector<32x256xf32>
    %c0_17 = arith.constant 0 : index
    %c0_18 = arith.constant 0 : index
    %25 = vector.load %arg6[%c0_17, %c0_18] : memref<1x32xf32, #tpu.memory_space<vmem>>, vector<1x32xf32>
    %cst_19 = arith.constant dense<0.000000e+00> : vector<1x256xf32>
    %26 = tpu.matmul %25, %24, %cst_19 {dimension_numbers = #tpu.dot_dimension_numbers<[1], [0], [0], [1], [0, 0, 1, 1], [], []>} : vector<1x32xf32>, vector<32x256xf32>, vector<1x256xf32> -> vector<1x256xf32>
    %c0_20 = arith.constant 0 : index
    %c0_21 = arith.constant 0 : index
    %27 = vector.load %arg7[%c0_20, %c0_21] : memref<1x1xf32, #tpu.memory_space<vmem>>, vector<1x1xf32>
    %28 = vector.broadcast %27 : vector<1x1xf32> to vector<1x256xf32>
    %29 = arith.addf %26, %28 : vector<1x256xf32>
    %c0_22 = arith.constant 0 : index
    %c0_23 = arith.constant 0 : index
    %30 = vector.load %arg8[%c0_22, %c0_23] : memref<1x256xf32, #tpu.memory_space<vmem>>, vector<1x256xf32>
    tpu.vector_store %arg8[%c0_22, %c0_23], %29 {strides = array<i32>} : memref<1x256xf32, #tpu.memory_space<vmem>>, vector<1x256xf32>,
    return
  }
  func.func @transform_0(%arg0: i32) -> (i32, i32) {
    %c0_i32 = arith.constant 0 : i32
    %c0_i32_0 = arith.constant 0 : i32
    return %c0_i32, %arg0 : i32, i32
  }
  func.func @transform_1(%arg0: i32) -> (i32, i32) {
    %c0_i32 = arith.constant 0 : i32
    %c0_i32_0 = arith.constant 0 : i32
    %c0_i32_1 = arith.constant 0 : i32
    return %c0_i32, %c0_i32_0 : i32, i32
  }
  func.func @transform_2(%arg0: i32) -> (i32, i32) {
    %c0_i32 = arith.constant 0 : i32
    %c0_i32_0 = arith.constant 0 : i32
    %c0_i32_1 = arith.constant 0 : i32
    return %c0_i32, %c0_i32_0 : i32, i32
  }
  func.func @transform_3(%arg0: i32) -> (i32, i32, i32) {
    %c0_i32 = arith.constant 0 : i32
    %c0_i32_0 = arith.constant 0 : i32
    %c0_i32_1 = arith.constant 0 : i32
    %c0_i32_2 = arith.constant 0 : i32
    return %c0_i32, %c0_i32_0, %c0_i32_1 : i32, i32, i32
  }
  func.func @transform_4(%arg0: i32) -> (i32, i32, i32) {
    %c0_i32 = arith.constant 0 : i32
    %c0_i32_0 = arith.constant 0 : i32
    %c0_i32_1 = arith.constant 0 : i32
    %c0_i32_2 = arith.constant 0 : i32
    return %c0_i32, %c0_i32_0, %c0_i32_1 : i32, i32, i32
  }
  func.func @transform_5(%arg0: i32) -> (i32, i32) {
    %c0_i32 = arith.constant 0 : i32
    %c0_i32_0 = arith.constant 0 : i32
    %c0_i32_1 = arith.constant 0 : i32
    return %c0_i32, %c0_i32_0 : i32, i32
  }
  func.func @transform_6(%arg0: i32) -> (i32, i32) {
    %c0_i32 = arith.constant 0 : i32
    %c0_i32_0 = arith.constant 0 : i32
    %c0_i32_1 = arith.constant 0 : i32
    return %c0_i32, %c0_i32_0 : i32, i32
  }
  func.func @transform_7(%arg0: i32) -> (i32, i32) {
    %c0_i32 = arith.constant 0 : i32
    %c0_i32_0 = arith.constant 0 : i32
    return %c0_i32, %arg0 : i32, i32
  }
}

</mosaic_0001>

<bundles_post_ra>
// kernel: tpu_custom_call.1
= control target key start
LH: loop header
LB: loop body
LE: loop exit
PB: predicated region body
PF: predicated region fallthrough
CT: control target
= control target key end

     0   :  { %s762_s0 = inlined_call_operand.vmem [shape: f32[1,256], index: 0, kind: input, shape index: {}]   ;;  %s763_s1 = inlined_call_operand.vmem [shape: f32[32,1], index: 1, kind: input, shape index: {}]   ;;  %s764_s2 = inlined_call_operand.vmem [shape: f32[32,1], index: 2, kind: input, shape index: {}]   ;;  %s765_s3 = inlined_call_operand.vmem [shape: f32[2,32,32], index: 3, kind: input, shape index: {}]   ;;  %s766_s4 = inlined_call_operand.vmem [shape: f32[2,32,1], index: 4, kind: input, shape index: {}]   ;;  %s767_s5 = inlined_call_operand.vmem [shape: f32[1,32], index: 5, kind: input, shape index: {}]   ;;  %s768_s6 = inlined_call_operand.<no memory space> [shape: f32[1,1], index: 6, kind: input, shape index: {}]   ;;  %s769_s7 = inlined_call_operand.hbm [shape: f32[1,256], index: 7, kind: output, shape index: {}]  }
   0x1   :  { %v12_v0 = vstv %s768_s6 }
   0x2   :  { %13 = vst [vmem:[#allocation2] sm:$0x1] %v12_v0 }
   0x3   :  { %v76_v1 = vld [vmem:[%s764_s2 + $0x18] sm:$0xff]  ;;  %v605_v3 = vmov 0   ;;  %v31_v4 = vld [vmem:[%s763_s1 + $0x10] sm:$0xff]  ;;  %v30_v5 = vld [vmem:[%s763_s1 + $0x8] sm:$0xff] }
   0x4   :  { %v32_v2 = vld [vmem:[%s763_s1 + $0x18] sm:$0xff]  ;;  %534 = vset.pattern.permute.xlu1 %v605_v3  ;;  %533 = vset.pattern.permute.xlu0 %v605_v3 }
   0x5   :  { %94 = vperm.xlu1 %534, %v76_v1   ;;  %51 = vperm.xlu0 %533, %v32_v2  }
   0x9   :  { %46 = vperm.xlu0 %533, %v31_v4   ;;  %41 = vperm.xlu1 %534, %v30_v5  }
   0xa   :  { %14 = vsyncpa [#allocation4], 0  ;;  %v75_v6 = vld [vmem:[%s764_s2 + $0x10] sm:$0xff]  ;;  %v29_v7 = vld [vmem:[%s763_s1] sm:$0xff]  ;;  %v606_v19 = vmov 0.0   ;;  %v55_v20 = vlaneseq  ;;  %vm141_vm0 = vcmask 261120  }
   0xb   :  { %v74_v8 = vld [vmem:[%s764_s2 + $0x8] sm:$0xff]  ;;  %v73_v9 = vld [vmem:[%s764_s2] sm:$0xff]  ;;  %v120_v10 = vld [vmem:[%s766_s4 + $0x18] sm:$0xff]  ;;  %218 = vmatprep.mubr.f32.mxu0 %v606_v19  ;;  %357 = vmatprep.mubr.f32.mxu1 %v606_v19 }
   0xc   :  { %v119_v11 = vld [vmem:[%s766_s4 + $0x10] sm:$0xff]  ;;  %v118_v12 = vld [vmem:[%s766_s4 + $0x8] sm:$0xff]  ;;  %v117_v13 = vld [vmem:[%s766_s4] sm:$0xff]  ;;  %v703_v21 = vshrl.u32 %v55_v20, 7  ;;  %vm495_vm1 = vcmp.lt.s32.totalorder %v55_v20, 256 }
   0xd   :  { %89 = vperm.xlu0 %533, %v75_v6   ;;  %36 = vperm.xlu1 %534, %v29_v7   ;;  %v523_v14 = vld [vmem:[%s766_s4 + $0x38] sm:$0xff]  ;;  %v522_v15 = vld [vmem:[%s766_s4 + $0x30] sm:$0xff]  ;;  %v521_v16 = vld [vmem:[%s766_s4 + $0x28] sm:$0xff] }
   0xe   :  { %v520_v17 = vld [vmem:[%s766_s4 + $0x20] sm:$0xff]  ;;  %v57_v22 = vsub.s32 0, %v703_v21  ;;  %v61_v23 = vsub.s32 1, %v703_v21  ;;  %v114_v60 = vld [vmem:[%s765_s3 + $0x8] sm:$0xff]  ;;  %v115_v61 = vld [vmem:[%s765_s3 + $0x10] sm:$0xff] }
   0xf   :  { %v391_v18 = vld [vmem:[#allocation2] sm:$0x1]  ;;  %v116_v62 = vld [vmem:[%s765_s3 + $0x18] sm:$0xff] }
  0x10   :  { %v33_v24 = vld [vmem:[%s762_s0] sm:$0x3] }
  0x11   :  { %84 = vperm.xlu0 %533, %v74_v8   ;;  %79 = vperm.xlu1 %534, %v73_v9   ;;  %v58_v25 = vrot.slane %v33_v24, %v57_v22  ;;  %v62_v26 = vrot.slane %v33_v24, %v61_v23  ;;  %v113_v58 = vld [vmem:[%s765_s3] sm:$0xff] }
  0x15   :  { %138 = vperm.xlu0 %533, %v120_v10   ;;  %133 = vperm.xlu1 %534, %v119_v11  }
  0x19   :  { %128 = vperm.xlu0 %533, %v118_v12   ;;  %123 = vperm.xlu1 %534, %v117_v13  }
  0x1d   :  { %278 = vperm.xlu0 %533, %v523_v14   ;;  %273 = vperm.xlu1 %534, %v522_v15  }
  0x21   :  { %268 = vperm.xlu0 %533, %v521_v16   ;;  %263 = vperm.xlu1 %534, %v520_v17  }
  0x25   :  { %394 = vperm.xlu0 %533, %v391_v18  }
  0x80   :  { %v95_v27 = vpop.permute.xlu1 %94  ;;  %v52_v28 = vpop.permute.xlu0 %51 }
  0x81   :  { %v71_v29 = vmul.f32 %v58_v25, %v52_v28  ;;  %v72_v30 = vmul.f32 %v62_v26, %v52_v28 }
  0x83   :  { %v103_v31 = vadd.f32 %v95_v27, %v71_v29  ;;  %v104_v32 = vadd.f32 %v95_v27, %v72_v30  ;;  %v516_v30 = vld [vmem:[%s765_s3 + $0x20] sm:$0xff] }
  0x84   :  { %v47_v33 = vpop.permute.xlu0 %46  ;;  %v42_v34 = vpop.permute.xlu1 %41 }
  0x85   :  { %535 = vtanh.f32 %v103_v31  ;;  %v69_v35 = vmul.f32 %v58_v25, %v47_v33  ;;  %v70_v36 = vmul.f32 %v62_v26, %v47_v33  ;;  %v67_v41 = vmul.f32 %v58_v25, %v42_v34  ;;  %v518_v33 = vld [vmem:[%s765_s3 + $0x30] sm:$0xff] }
  0x86   :  { %537 = vtanh.f32 %v104_v32  ;;  %v68_v42 = vmul.f32 %v62_v26, %v42_v34  ;;  %v517_v32 = vld [vmem:[%s765_s3 + $0x28] sm:$0xff]  ;;  %v519_v34 = vld [vmem:[%s765_s3 + $0x38] sm:$0xff] }
  0x88   :  { %v90_v37 = vpop.permute.xlu0 %89  ;;  %v37_v38 = vpop.permute.xlu1 %36 }
  0x89   :  { %v101_v39 = vadd.f32 %v90_v37, %v69_v35  ;;  %v102_v40 = vadd.f32 %v90_v37, %v70_v36  ;;  %v66_v43 = vmul.f32 %v62_v26, %v37_v38  ;;  %v65_v46 = vmul.f32 %v58_v25, %v37_v38 }
  0x8b   :  { %539 = vtanh.f32 %v101_v39 }
  0x8c   :  { %541 = vtanh.f32 %v102_v40  ;;  %v85_v44 = vpop.permute.xlu0 %84  ;;  %v80_v45 = vpop.permute.xlu1 %79 }
  0x8d   :  { %v99_v47 = vadd.f32 %v85_v44, %v67_v41  ;;  %v100_v48 = vadd.f32 %v85_v44, %v68_v42  ;;  %v98_v49 = vadd.f32 %v80_v45, %v66_v43  ;;  %v97_v50 = vadd.f32 %v80_v45, %v65_v46 }
  0x8f   :  { %543 = vtanh.f32 %v99_v47 }
  0x90   :  { %545 = vtanh.f32 %v100_v48  ;;  %v139_v4 = vpop.permute.xlu0 %138  ;;  %v134_v6 = vpop.permute.xlu1 %133 }
  0x91   :  { %547 = vtanh.f32 %v98_v49 }
  0x92   :  { %v536_v51 = vpop.eup %535  ;;  %549 = vtanh.f32 %v97_v50 }
  0x93   :  { %v538_v52 = vpop.eup %537 }
  0x94   :  { %178 = vmatprep.subr.mxu0 %v538_v52  ;;  %v129_v12 = vpop.permute.xlu0 %128  ;;  %v124_v15 = vpop.permute.xlu1 %123 }
  0x95   :  { %179 = vmatpush1.msra.mxu0 %v536_v51 }
  0x98   :  { %v540_v53 = vpop.eup %539  ;;  %v279_v40 = vpop.permute.xlu0 %278 }
  0x99   :  { %v542_v54 = vpop.eup %541  ;;  %v274_v42 = vpop.permute.xlu1 %273 }
  0x9a   :  { %180 = vmatprep.subr.mxu0 %v542_v54 }
  0x9b   :  { %181 = vmatpush1.msra.mxu0 %v540_v53 }
  0x9c   :  { %v544_v55 = vpop.eup %543 }
  0x9d   :  { %v546_v56 = vpop.eup %545  ;;  %v264_v50 = vpop.permute.xlu1 %263 }
  0x9e   :  { %182 = vmatprep.subr.mxu0 %v546_v56  ;;  %v548_v57 = vpop.eup %547 }
  0x9f   :  { %183 = vmatpush1.msra.mxu0 %v544_v55  ;;  %v550_v59 = vpop.eup %549 }
  0xa0   :  { %184 = vmatprep.subr.mxu0 %v548_v57 }
  0xa1   :  { %185 = vmatpush1.msra.mxu0 %v550_v59 }
  0xa2   :  { %512 = vmatmul.mubr.msk.f32.vlgmr.msra.gmra.mxu0 %vm141_vm0, %v113_v58 }
  0xa3   :  { %224 = vmatprep.mubr.f32.mxu0 %v606_v19 }
  0xa6   :  { %513 = vmatmul.mubr.msk.f32.gmra.mxu0 %vm141_vm0, %v114_v60 }
  0xa7   :  { %230 = vmatprep.mubr.f32.mxu0 %v606_v19 }
  0xaa   :  { %514 = vmatmul.mubr.msk.f32.gmra.mxu0 %vm141_vm0, %v115_v61  ;;  %v390_v61 = vld [vmem:[%s767_s5] sm:$0x1]  ;;  %s608_s5 = smov [#allocation3]  }
  0xab   :  { %236 = vmatprep.mubr.f32.mxu0 %v606_v19  ;;  %s504_s24 = sshll.u32 %s608_s5, 4  ;;  %s505_s24 = int_to_ptr.vmem [resolvable:$true] %s504_s24 }
  0xac   :  { %s583_s2 = scalar_lea.vmem %s505_s24, 32  ;;  %p588_p1 = scmp.lt.s32.totalorder %s505_s24, %s505_s24 }
  0xad   :  { %p584_p0 = scmp.ne.s32.totalorder %s505_s24, %s583_s2  ;;  %p589_p2 = scmp.lt.s32.totalorder %s583_s2, %s583_s2 }
  0xae   :  { %515 = vmatmul.mubr.msk.f32.gmra.mxu0 %vm141_vm0, %v116_v62 }
  0xaf   :  { %468 = vmatprep.mubr.f32.mxu0 %v606_v19  ;;  %p590_p3 = por %p589_p2, %p588_p1 }
  0xb1   :  { %p591_p4 = pnand %p590_p3, %p584_p0 }
 0x162   :  { %v220_v63 = vpop.f32.mrf.mxu0 }
 0x163   :  { %v221_v18 = vadd.f32 %v220_v63, %v124_v15  ;;  %v607_v63 = vmov 1966171168  }
 0x164   :  { %v222_v0 = vpop.f32.mrf.mxu0 }
 0x165   :  { %v223_v17 = vadd.f32 %v222_v0, %v124_v15  ;;  %v479_v0 = vunpack.c.l.s4 %v607_v63 }
 0x166   :  { %v226_v1 = vpop.f32.mrf.mxu0 }
 0x167   :  { %v227_v16 = vadd.f32 %v226_v1, %v129_v12 }
 0x168   :  { %v228_v2 = vpop.f32.mrf.mxu0 }
 0x169   :  { %v229_v14 = vadd.f32 %v228_v2, %v129_v12  ;;  %v480_v2 = vunpack.c.0.s8 %v479_v0 }
 0x16a   :  { %v232_v3 = vpop.f32.mrf.mxu0 }
 0x16b   :  { %v233_v13 = vadd.f32 %v232_v3, %v134_v6 }
 0x16c   :  { %v234_v5 = vpop.f32.mrf.mxu0 }
 0x16d   :  { %v235_v10 = vadd.f32 %v234_v5, %v134_v6 }
 0x16e   :  { %v238_v7 = vpop.f32.mrf.mxu0 }
 0x16f   :  { %v239_v8 = vadd.f32 %v238_v7, %v139_v4 }
 0x170   :  { %v240_v9 = vpop.f32.mrf.mxu0 }
 0x171   :  { %v241_v11 = vadd.f32 %v240_v9, %v139_v4 }
 0x173   :  { %551 = vtanh.f32 %v241_v11 }
 0x174   :  { %553 = vtanh.f32 %v239_v8  ;;  %v483_v8 = vsub.s32 %v480_v2, %v703_v21 }
 0x175   :  { %555 = vtanh.f32 %v235_v10 }
 0x176   :  { %557 = vtanh.f32 %v233_v13 }
 0x177   :  { %559 = vtanh.f32 %v229_v14 }
 0x178   :  { %561 = vtanh.f32 %v227_v16 }
 0x179   :  { %563 = vtanh.f32 %v223_v17 }
 0x17a   :  { %565 = vtanh.f32 %v221_v18 }
 0x180   :  { %v552_v23 = vpop.eup %551 }
 0x181   :  { %v554_v24 = vpop.eup %553  ;;  %317 = vmatprep.subr.mxu1 %v552_v23 }
 0x182   :  { %v556_v25 = vpop.eup %555  ;;  %318 = vmatpush1.msra.mxu1 %v554_v24 }
 0x183   :  { %v558_v26 = vpop.eup %557  ;;  %319 = vmatprep.subr.mxu1 %v556_v25 }
 0x184   :  { %v560_v27 = vpop.eup %559  ;;  %320 = vmatpush1.msra.mxu1 %v558_v26 }
 0x185   :  { %v562_v28 = vpop.eup %561  ;;  %321 = vmatprep.subr.mxu1 %v560_v27 }
 0x186   :  { %v564_v29 = vpop.eup %563  ;;  %322 = vmatpush1.msra.mxu1 %v562_v28 }
 0x187   :  { %v566_v31 = vpop.eup %565  ;;  %323 = vmatprep.subr.mxu1 %v564_v29 }
 0x188   :  { %324 = vmatpush1.msra.mxu1 %v566_v31 }
 0x189   :  { %524 = vmatmul.mubr.msk.f32.vlgmr.msra.gmra.mxu1 %vm141_vm0, %v516_v30 }
 0x18a   :  { %363 = vmatprep.mubr.f32.mxu1 %v606_v19 }
 0x18d   :  { %525 = vmatmul.mubr.msk.f32.gmra.mxu1 %vm141_vm0, %v517_v32 }
 0x18e   :  { %369 = vmatprep.mubr.f32.mxu1 %v606_v19 }
 0x191   :  { %526 = vmatmul.mubr.msk.f32.gmra.mxu1 %vm141_vm0, %v518_v33 }
 0x192   :  { %375 = vmatprep.mubr.f32.mxu1 %v606_v19  ;;  %v269_v19 = vpop.permute.xlu0 %268 }
 0x195   :  { %527 = vmatmul.mubr.msk.f32.gmra.mxu1 %vm141_vm0, %v519_v34 }
 0x196   :  { %v395_v1 = vpop.permute.xlu0 %394 }
 0x197   :  { %v400_v4 = vrot.slane %v395_v1, %v57_v22 }
 0x249   :  { %v359_v35 = vpop.f32.mrf.mxu1 }
 0x24a   :  { %v360_v53 = vadd.f32 %v359_v35, %v264_v50 }
 0x24b   :  { %v361_v36 = vpop.f32.mrf.mxu1 }
 0x24c   :  { %v362_v52 = vadd.f32 %v361_v36, %v264_v50 }
 0x24d   :  { %v365_v37 = vpop.f32.mrf.mxu1 }
 0x24e   :  { %v366_v51 = vadd.f32 %v365_v37, %v269_v19 }
 0x24f   :  { %v367_v38 = vpop.f32.mrf.mxu1 }
 0x250   :  { %v368_v49 = vadd.f32 %v367_v38, %v269_v19 }
 0x251   :  { %v371_v39 = vpop.f32.mrf.mxu1 }
 0x252   :  { %v372_v48 = vadd.f32 %v371_v39, %v274_v42 }
 0x253   :  { %v373_v41 = vpop.f32.mrf.mxu1 }
 0x254   :  { %v374_v46 = vadd.f32 %v373_v41, %v274_v42 }
 0x255   :  { %v377_v43 = vpop.f32.mrf.mxu1 }
 0x256   :  { %v378_v44 = vadd.f32 %v377_v43, %v279_v40 }
 0x257   :  { %v379_v45 = vpop.f32.mrf.mxu1 }
 0x258   :  { %v380_v47 = vadd.f32 %v379_v45, %v279_v40 }
 0x25a   :  { %567 = vtanh.f32 %v380_v47 }
 0x25b   :  { %569 = vtanh.f32 %v378_v44 }
 0x25c   :  { %571 = vtanh.f32 %v374_v46 }
 0x25d   :  { %573 = vtanh.f32 %v372_v48 }
 0x25e   :  { %575 = vtanh.f32 %v368_v49 }
 0x25f   :  { %577 = vtanh.f32 %v366_v51 }
 0x260   :  { %579 = vtanh.f32 %v362_v52 }
 0x261   :  { %581 = vtanh.f32 %v360_v53 }
 0x267   :  { %v568_v54 = vpop.eup %567 }
 0x268   :  { %v570_v55 = vpop.eup %569  ;;  %428 = vmatprep.subr.mxu0 %v568_v54 }
 0x269   :  { %v572_v56 = vpop.eup %571  ;;  %429 = vmatpush1.msra.mxu0 %v570_v55 }
 0x26a   :  { %v574_v57 = vpop.eup %573  ;;  %430 = vmatprep.subr.mxu0 %v572_v56 }
 0x26b   :  { %v576_v58 = vpop.eup %575  ;;  %431 = vmatpush1.msra.mxu0 %v574_v57 }
 0x26c   :  { %v578_v59 = vpop.eup %577  ;;  %432 = vmatprep.subr.mxu0 %v576_v58 }
 0x26d   :  { %v580_v60 = vpop.eup %579  ;;  %433 = vmatpush1.msra.mxu0 %v578_v59 }
 0x26e   :  { %v582_v62 = vpop.eup %581  ;;  %434 = vmatprep.subr.mxu0 %v580_v60 }
 0x26f   :  { %435 = vmatpush1.msra.mxu0 %v582_v62 }
 0x270   :  { %528 = vmatmul.mubr.msk.f32.vlgmr.msra.gmra.mxu0 %vm141_vm0, %v390_v61 }
 0x330   :  { %v470_v3 = vpop.f32.mrf.mxu0 }
 0x331   :  { %v471_v6 = vadd.f32 %v470_v3, %v400_v4 }
 0x332   :  { %v472_v5 = vpop.f32.mrf.mxu0 }
 0x333   :  { %v473_v7 = vadd.f32 %v472_v5, %v400_v4 }
 0x335   :  { %v477_v9 = vcombine.low %v471_v6, %v473_v7 }
 0x337   :  { %v484_v10 = vrot.slane %v477_v9, %v483_v8 }
 0x339   :  { %v491_v11 = vrot.slane %v484_v10, %v483_v8 }
 0x33b   :  { %497 = vst.msk [vmem:[#allocation3] sm:$0x3] %vm495_vm1, %v491_v11 }
 0x33c   :  { %594 = shalt.err (!%p591_p4)
}
 0x33d   :  { %507 = dma.vmem_to_hbm [thread:$0]  %s505_s24, 32, %s769_s7, [#allocation4]  }
 0x33e   :  { %603 = dma.done.wait [#allocation4], 32  }
 0x33f   :  { %604 = vsyncadd [#allocation4], 4294967264 }
 0x340   :  { %511 = vsyncpa [#allocation4], 1 }

</bundles_post_ra>
